<compile_context>
chip_gen: v5e
topology: v5e:2x2
jax: 0.10.0
libtpu: 0.0.40
codegen_flags: <defaults>
</compile_context>

<pallas_src>
import math
import functools

import jax
import jax.numpy as jnp
from jax.experimental import pallas as pl
from jax.experimental.pallas import tpu as pltpu


# ----------------------------------------------------------------------------
# Positional-encoding table (same math as the torch __init__).
# ----------------------------------------------------------------------------
def make_pe_table(d_model: int, max_len: int = 5000) -> jnp.ndarray:
    position = jnp.arange(0, max_len, dtype=jnp.float32)[:, None]          # (max_len, 1)
    div_term = jnp.exp(
        jnp.arange(0, d_model, 2, dtype=jnp.float32) * (-math.log(10000.0) / d_model)
    )                                                                       # (d_model//2,)
    ang = position * div_term                                               # (max_len, d_model//2)
    pe = jnp.zeros((max_len, d_model), dtype=jnp.float32)
    pe = pe.at[:, 0::2].set(jnp.sin(ang))
    pe = pe.at[:, 1::2].set(jnp.cos(ang))
    return pe                                                               # (max_len, d_model)


# ----------------------------------------------------------------------------
# Kernels
# ----------------------------------------------------------------------------
# 2D lane-dense path: x block (ts, B*D), pe block (ts, D). pe is broadcast to
# the B batch copies via a single lane concat per grid step (small-D fallback).
def _pe_add_2d(x_ref, pe_ref, o_ref, *, B: int):
    pe = pe_ref[...]
    if B > 1:
        pe = jnp.concatenate([pe] * B, axis=-1)
    o_ref[...] = (x_ref[...] + pe).astype(o_ref.dtype)


def _pe_add_dropout_2d(x_ref, pe_ref, bits_ref, o_ref, *, B: int, thr: int, scale: float):
    pe = pe_ref[...]
    if B > 1:
        pe = jnp.concatenate([pe] * B, axis=-1)
    y = x_ref[...] + pe
    keep = bits_ref[...] >= jnp.uint32(thr)     # keep with prob ~ (1 - p)
    o_ref[...] = jnp.where(keep, y * scale, 0.0).astype(o_ref.dtype)


# 3D path (D % 128 == 0 and B >= 8): x block (ts, B, D), pe block (ts, 1, D).
# pe broadcasts along the sublane (batch) axis — essentially free on the VPU
# operand path, no lane-concat temporary.
def _pe_add_3d(x_ref, pe_ref, o_ref):
    o_ref[...] = (x_ref[...] + pe_ref[...]).astype(o_ref.dtype)


def _pe_add_dropout_3d(x_ref, pe_ref, bits_ref, o_ref, *, thr: int, scale: float):
    y = x_ref[...] + pe_ref[...]
    keep = bits_ref[...] >= jnp.uint32(thr)
    o_ref[...] = jnp.where(keep, y * scale, 0.0).astype(o_ref.dtype)


# ----------------------------------------------------------------------------
# Tiling
# ----------------------------------------------------------------------------
def _choose_seq_tile(S: int, row_bytes: int, target_bytes: int, row_mult: int) -> int:
    """Sequence tile: ~target_bytes per x/out block, rounded to row_mult rows
    (8 for f32, 16 for bf16, 32 for int8/fp8), and clamped to ceil(S/2) so the
    grid has >= 2 steps (v7x megacore + bounded double-buffered VMEM)."""
    if S <= row_mult:
        return S
    ts = max(row_mult, target_bytes // max(row_bytes, 1))
    ts = (ts // row_mult) * row_mult
    half = -(-S // 2)                               # ceil(S/2)
    half = -(-half // row_mult) * row_mult          # round up to row_mult
    ts = min(ts, half)
    return max(row_mult, min(ts, S))


# ----------------------------------------------------------------------------
# Wrapper
# ----------------------------------------------------------------------------
def positional_encoding(
    x: jnp.ndarray,            # (S, B, D)
    pe_table: jnp.ndarray,     # (max_len, D) float32
    *,
    dropout_p: float = 0.1,
    training: bool = False,
    rng_key=None,
    target_block_bytes: int = 1 << 20,   # ~1 MiB x/out blocks: safe on v5e/v6e/v7x
    donate_x: bool = False,              # alias output onto x (caller donates x)
) -> jnp.ndarray:
    S, B, D = x.shape
    assert pe_table.shape[0] >= S and pe_table.shape[1] == D
    assert 0.0 <= dropout_p < 1.0

    itemsize = jnp.dtype(x.dtype).itemsize
    row_mult = 8 * max(1, 4 // itemsize)            # dtype-aware sublane packing
    pe_slice = pe_table[:S]                         # (S, D) f32; add in f32, cast at store

    use_dropout = training and dropout_p > 0.0
    if use_dropout:
        if rng_key is None:
            rng_key = jax.random.PRNGKey(0)
        thr = min(int(round(dropout_p * 4294967296.0)), 4294967295)
        scale = 1.0 / (1.0 - dropout_p)

    cparams = pltpu.CompilerParams(dimension_semantics=("parallel",))
    io_alias = {0: 0} if donate_x else {}

    row_bytes = B * D * itemsize
    ts = _choose_seq_tile(S, row_bytes, target_block_bytes, row_mult)
    grid = (pl.cdiv(S, ts),)

    use_3d = (D % 128 == 0) and (B >= 8)

    if use_3d:
        # Sublane-broadcast path: lane dim D is already a multiple of 128.
        pe3 = pe_slice.reshape(S, 1, D)
        out_shape = jax.ShapeDtypeStruct((S, B, D), x.dtype)
        x_spec = pl.BlockSpec((ts, B, D), lambda i: (i, 0, 0))
        pe_spec = pl.BlockSpec((ts, 1, D), lambda i: (i, 0, 0))

        if not use_dropout:
            cost = pl.CostEstimate(flops=S * B * D, transcendentals=0,
                                   bytes_accessed=2 * S * B * D * itemsize + S * D * 4)
            return pl.pallas_call(
                _pe_add_3d,
                out_shape=out_shape,
                grid_spec=pltpu.PrefetchScalarGridSpec(
                    num_scalar_prefetch=0, grid=grid,
                    in_specs=[x_spec, pe_spec], out_specs=x_spec),
                compiler_params=cparams,
                cost_estimate=cost,
                input_output_aliases=io_alias,
            )(x, pe3)

        bits = jax.random.bits(rng_key, (S, B, D), dtype=jnp.uint32)
        cost = pl.CostEstimate(flops=3 * S * B * D, transcendentals=0,
                               bytes_accessed=2 * S * B * D * itemsize
                               + S * B * D * 4 + S * D * 4)
        return pl.pallas_call(
            functools.partial(_pe_add_dropout_3d, thr=thr, scale=scale),
            out_shape=out_shape,
            grid_spec=pltpu.PrefetchScalarGridSpec(
                num_scalar_prefetch=0, grid=grid,
                in_specs=[x_spec, pe_spec, x_spec], out_specs=x_spec),
            compiler_params=cparams,
            cost_estimate=cost,
            input_output_aliases=io_alias,
        )(x, pe3, bits)

    # ---- 2D lane-dense fallback: flatten to (S, B*D). Fully lane-dense
    # (unmasked stores) when B*D % 128 == 0; still correct otherwise, just
    # masked partial stores on the output.
    BD = B * D
    x2 = x.reshape(S, BD)
    out_shape = jax.ShapeDtypeStruct((S, BD), x.dtype)
    x_spec = pl.BlockSpec((ts, BD), lambda i: (i, 0))
    pe_spec = pl.BlockSpec((ts, D), lambda i: (i, 0))

    if not use_dropout:
        cost = pl.CostEstimate(flops=S * BD, transcendentals=0,
                               bytes_accessed=2 * S * BD * itemsize + S * D * 4)
        out2 = pl.pallas_call(
            functools.partial(_pe_add_2d, B=B),
            out_shape=out_shape,
            grid_spec=pltpu.PrefetchScalarGridSpec(
                num_scalar_prefetch=0, grid=grid,
                in_specs=[x_spec, pe_spec], out_specs=x_spec),
            compiler_params=cparams,
            cost_estimate=cost,
            input_output_aliases=io_alias,
        )(x2, pe_slice)
        return out2.reshape(S, B, D)

    bits = jax.random.bits(rng_key, (S, BD), dtype=jnp.uint32)
    cost = pl.CostEstimate(flops=3 * S * BD, transcendentals=0,
                           bytes_accessed=2 * S * BD * itemsize + S * BD * 4 + S * D * 4)
    out2 = pl.pallas_call(
        functools.partial(_pe_add_dropout_2d, B=B, thr=thr, scale=scale),
        out_shape=out_shape,
        grid_spec=pltpu.PrefetchScalarGridSpec(
            num_scalar_prefetch=0, grid=grid,
            in_specs=[x_spec, pe_spec, x_spec], out_specs=x_spec),
        compiler_params=cparams,
        cost_estimate=cost,
        input_output_aliases=io_alias,
    )(x2, pe_slice, bits)
    return out2.reshape(S, B, D)


# ----------------------------------------------------------------------------
# Main
# ----------------------------------------------------------------------------
if __name__ == "__main__":
    key = jax.random.PRNGKey(0)
    k1, k2, k3 = jax.random.split(key, 3)

    # Case 1: small D (32), B*D = 128 -> lane-dense 2D path.
    S, B, D = 64, 4, 32
    MAX_LEN = 128
    x = jax.random.normal(k1, (S, B, D), dtype=jnp.float32)
    pe_table = make_pe_table(D, MAX_LEN)
    ref = x + pe_table[:S][:, None, :]

    # Eval-mode forward (dropout is identity in eval, matching nn.Dropout).
    out = positional_encoding(x, pe_table, dropout_p=0.1, training=False)
    out = jax.block_until_ready(out)
    assert out.shape == (S, B, D)
    assert jnp.allclose(out, ref, atol=1e-6), "eval-mode mismatch vs reference"

    # Training-mode forward: every element must be 0 or ref * 1/(1-p), and the
    # keep fraction must be close to 1 - p.
    # TODO(synk): dropout mask comes from jax.random bits; it is valid inverted
    # dropout but will not bit-match torch's RNG stream.
    p = 0.1
    out_tr = positional_encoding(x, pe_table, dropout_p=p, training=True, rng_key=k2)
    out_tr = jax.block_until_ready(out_tr)
    scale = 1.0 / (1.0 - p)
    dropped = jnp.isclose(out_tr, 0.0)
    kept = jnp.isclose(out_tr, ref * scale, atol=1e-5, rtol=1e-5)
    assert bool(jnp.all(dropped | kept)), "training-mode values not in {0, y/(1-p)}"
    keep_frac = float(jnp.mean(kept.astype(jnp.float32)))
    assert 0.8 < keep_frac < 0.97, f"unexpected keep fraction {keep_frac}"

    # Case 2: D % 128 == 0 and B >= 8 -> 3D sublane-broadcast path.
    S2, B2, D2 = 48, 8, 128
    x_b = jax.random.normal(k3, (S2, B2, D2), dtype=jnp.float32)
    pe_table2 = make_pe_table(D2, 128)
    ref2 = x_b + pe_table2[:S2][:, None, :]
    out_b = positional_encoding(x_b, pe_table2, dropout_p=0.1, training=False)
    out_b = jax.block_until_ready(out_b)
    assert out_b.shape == (S2, B2, D2)
    assert jnp.allclose(out_b, ref2, atol=1e-6), "3D-path eval mismatch vs reference"

    print("KERNEL_OK")
</pallas_src>

<mosaic_0001>
module attributes {stable_mosaic.version = 11 : i64} {
  func.func @_pe_add_2d(%arg0: i32, %arg1: memref<32x128xf32, #tpu.memory_space<vmem>>, %arg2: memref<32x32xf32, #tpu.memory_space<vmem>>, %arg3: memref<32x128xf32, #tpu.memory_space<vmem>>) attributes {dimension_semantics = [#tpu.dimension_semantics<parallel>], iteration_bounds = array<i64: 2>, scalar_prefetch = 0 : i64, scratch_operands = 0 : i64, tpu.core_type = #tpu.core_type<tc>, window_params = [{transform_indices = @transform_0, window_bounds = array<i64: 32, 128>}, {transform_indices = @transform_1, window_bounds = array<i64: 32, 32>}, {transform_indices = @transform_2, window_bounds = array<i64: 32, 128>}]} {
    %c0 = arith.constant 0 : index
    %c0_0 = arith.constant 0 : index
    %0 = vector.load %arg2[%c0, %c0_0] : memref<32x32xf32, #tpu.memory_space<vmem>>, vector<32x32xf32>
    %1 = tpu.concatenate %0, %0, %0, %0 in 1 : vector<32x32xf32>, vector<32x32xf32>, vector<32x32xf32>, vector<32x32xf32> -> vector<32x128xf32>
    %c0_1 = arith.constant 0 : index
    %c0_2 = arith.constant 0 : index
    %2 = vector.load %arg1[%c0_1, %c0_2] : memref<32x128xf32, #tpu.memory_space<vmem>>, vector<32x128xf32>
    %3 = arith.addf %2, %1 : vector<32x128xf32>
    %c0_3 = arith.constant 0 : index
    %c0_4 = arith.constant 0 : index
    %4 = vector.load %arg3[%c0_3, %c0_4] : memref<32x128xf32, #tpu.memory_space<vmem>>, vector<32x128xf32>
    tpu.vector_store %arg3[%c0_3, %c0_4], %3 {strides = array<i32>} : memref<32x128xf32, #tpu.memory_space<vmem>>, vector<32x128xf32>,
    return
  }
  func.func @transform_0(%arg0: i32) -> (i32, i32) {
    %c0_i32 = arith.constant 0 : i32
    %c0_i32_0 = arith.constant 0 : i32
    return %arg0, %c0_i32 : i32, i32
  }
  func.func @transform_1(%arg0: i32) -> (i32, i32) {
    %c0_i32 = arith.constant 0 : i32
    %c0_i32_0 = arith.constant 0 : i32
    return %arg0, %c0_i32 : i32, i32
  }
  func.func @transform_2(%arg0: i32) -> (i32, i32) {
    %c0_i32 = arith.constant 0 : i32
    %c0_i32_0 = arith.constant 0 : i32
    return %arg0, %c0_i32 : i32, i32
  }
}

</mosaic_0001>

<bundles_post_ra>
// kernel: tpu_custom_call.1
= control target key start
LH: loop header
LB: loop body
LE: loop exit
PB: predicated region body
PF: predicated region fallthrough
CT: control target
= control target key end

     0   :  { %7 = vsyncpa [#allocation3], 0  ;;  %s587_s0 = inlined_call_operand.vmem [shape: f32[64,128], index: 0, kind: input, shape index: {}]   ;;  %s588_s1 = inlined_call_operand.vmem [shape: f32[64,32], index: 1, kind: input, shape index: {}]   ;;  %s589_s2 = inlined_call_operand.hbm [shape: f32[64,128], index: 2, kind: output, shape index: {}]  }
   0x1   :  { %9 = vsyncpa [#allocation3 + $0x1], 0  ;;  %s471_s9 = smov 0   ;;  %s473_s10 = smov 0  }
   0x2   :  { %s475_s11 = smov 0   ;;  %s477_s12 = smov 0  }
   0x3 LB: > { %s492_s13 = sadd.s32 4294967295, %s449_s12   ;;  %s328_s14 = sadd.s32 4294967294, %s449_s12   ;;  %s449_s12 = sphi %s477_s12, %s595_s12   ;;  %s445_s11 = sphi %s475_s11, %s594_s11   ;;  %s441_s10 = sphi %s473_s10, %s593_s10   ;;  %s437_s9 = sphi %s471_s9, %s592_s9  }
   0x4   : > { %s496_s15 = sadd.s32 1, %s449_s12   ;;  %s74_s16 = sadd.s32 1, %s445_s11 }
   0x5   : > { %s71_s17 = ssub.s32 %s449_s12, %s496_s15  ;;  %p84_p0 = scmp.ne.s32.totalorder %s445_s11, %s441_s10 }
   0x6   : > { %p72_p1 = scmp.eq.s32.totalorder %s71_s17, 0  ;;  %p85_p2 = scmp.eq.s32.totalorder %s492_s13, 1 }
   0x7   : > { %p90_p3 = scmp.ne.s32.totalorder %s441_s10, %s437_s9  ;;  %p91_p4 = scmp.eq.s32.totalorder %s328_s14, 1 }
   0x8   : > { %s507_s18 = scalar_select %p72_p1, %s445_s11, %s74_s16  }
   0x9   : > { %p509_p5 = por %p85_p2, %p84_p0  ;;  %p513_p6 = por %p91_p4, %p90_p3 }
   0xa   : > { %p331_p7 = scmp.ge.s32.totalorder %s449_s12, 1  ;;  %p127_p8 = scmp.lt.s32.totalorder %s449_s12, 3 }
   0xc   : > { %p128_p9 = pnand %p331_p7, %p127_p8 }
   0xd   : > { %s333_s21 = sshll.u32 (!%p128_p9), %s492_s13, 2  ;;  %s451_s26 = smov (!%p128_p9), 32  }
   0xe   : > { %131 = sbr.rel (%p128_p9) target bundleno = 170 (0xaa), region = 28  ;;  %p155_p10 = scmp.lt.s32.totalorder (!%p128_p9), %s333_s21, 7 }
   0xf   : > { %s452_s27 = smov (!%p128_p9), 64   ;;  %s453_s28 = smov (!%p128_p9), 96  }
  0x10   : > { %s151_s29 = sand.u32 (!%p128_p9), 1, %s441_s10   ;;  %s342_s7 = sshll.u32 (!%p128_p9), %s492_s13, 5 }
  0x11   : > { %s332_s5 = sshll.u32 (!%p128_p9), %s151_s29, 5  ;;  %s250_s16 = scalar_lea.hbm (!%p128_p9), %s589_s2, %s342_s7 }
  0x12   : > { %s535_s6 = scalar_lea.vmem (!%p128_p9), [#allocation2], %s332_s5  ;;  %s239_s13 = scalar_lea.sflag (!%p128_p9), [#allocation3], %s151_s29 }
  0x13   : > { %s597_s21 = smov (!%p155_p10, %s333_s21), 7  ;;  %vm211_vm0 = vcmask 261120   ;;  %vm216_vm1 = vcmask 523264   ;;  %vm221_vm2 = vcmask 785408   ;;  %s251_s17 = sshll.u32 %s535_s6, 4  ;;  %s252_s17 = int_to_ptr.vmem [resolvable:$true] %s251_s17 }
  0x14   : > { %s334_s22 = sshll.u32 %s597_s21, 3  ;;  %s253_s21 = sshll.u32 %s250_s16, 4  ;;  %s254_s21 = int_to_ptr.hbm [resolvable:$true] %s253_s21 }
  0x15   : > { %s164_s25 = scalar_lea.vmem %s588_s1, %s334_s22  ;;  %s527_s4 = scalar_lea.vmem %s587_s0, %s334_s22 }
  0x16   : > { %v169_v0 = vld [vmem:[%s164_s25 + $0x10] sm:$0xff]  ;;  %v167_v1 = vld [vmem:[%s164_s25] sm:$0xff]  ;;  %v170_v2 = vld [vmem:[%s164_s25 + $0x18] sm:$0xff]  ;;  %s401_s22 = sshra.s32 %s254_s21, 4  ;;  %s402_s22 = int_to_ptr.hbm [resolvable:$true] %s401_s22 }
  0x17   : > { %179 = vrot.lane.b32.xlu1 %v169_v0, %s451_s26  ;;  %175 = vrot.lane.b32.xlu0 %v167_v1, %s451_s26  ;;  %v168_v3 = vld [vmem:[%s164_s25 + $0x8] sm:$0xff]  ;;  %v226_v10 = vld [vmem:[%s527_s4] sm:$0xff]  ;;  %s403_s23 = scalar_lea.hbm %s402_s22, 32  ;;  %p408_p0 = scmp.lt.s32.totalorder %s402_s22, %s589_s2 }
  0x18   : > { %187 = vrot.lane.b32.xlu2 %v167_v1, %s452_s27  ;;  %v229_v20 = vld [vmem:[%s527_s4 + $0x18] sm:$0xff]  ;;  %v228_v26 = vld [vmem:[%s527_s4 + $0x10] sm:$0xff]  ;;  %v227_v27 = vld [vmem:[%s527_s4 + $0x8] sm:$0xff]  ;;  %p404_p11 = scmp.ne.s32.totalorder %s402_s22, %s403_s23 }
  0x1a   : > { %p405_p12 = pnand %p404_p11, %p509_p5 }
  0x1c   : > { %p406_p13 = pneg %p405_p12 }
  0x1f   : > { %181 = vrot.lane.b32.xlu1 %v170_v2, %s451_s26  ;;  %177 = vrot.lane.b32.xlu0 %v168_v3, %s451_s26  ;;  %s407_s26 = scalar_lea.hbm %s589_s2, 64 }
  0x20   : > { %189 = vrot.lane.b32.xlu2 %v168_v3, %s452_s27  ;;  %p409_p1 = scmp.lt.s32.totalorder %s407_s26, %s403_s23 }
  0x22   : > { %p410_p2 = por %p409_p1, %p408_p0 }
  0x24   : > { %p411_p3 = pnand %p410_p2, %p406_p13 }
  0x27   : > { %193 = vrot.lane.b32.xlu1 %v170_v2, %s452_s27  ;;  %191 = vrot.lane.b32.xlu0 %v169_v0, %s452_s27 }
  0x28   : > { %199 = vrot.lane.b32.xlu2 %v167_v1, %s453_s28 }
  0x2f   : > { %203 = vrot.lane.b32.xlu1 %v169_v0, %s453_s28  ;;  %201 = vrot.lane.b32.xlu0 %v168_v3, %s453_s28 }
  0x30   : > { %205 = vrot.lane.b32.xlu2 %v170_v2, %s453_s28 }
  0x72   : > { %v188_v4 = vpop.permute.xlu2 %187 }
  0x7a   : > { %v190_v5 = vpop.permute.xlu2 %189 }
  0x82   : > { %v200_v6 = vpop.permute.xlu2 %199 }
  0x89   : > { %v180_v7 = vpop.permute.xlu1 %179  ;;  %v176_v8 = vpop.permute.xlu0 %175 }
  0x8a   : > { %v212_v9 = vsel %vm211_vm0, %v167_v1, %v176_v8  ;;  %v206_v16 = vpop.permute.xlu2 %205  ;;  %v214_v25 = vsel %vm211_vm0, %v169_v0, %v180_v7 }
  0x8b   : > { %v217_v11 = vsel %vm216_vm1, %v212_v9, %v188_v4 }
  0x8c   : > { %v222_v12 = vsel %vm221_vm2, %v217_v11, %v200_v6 }
  0x8d   : > { %v230_v13 = vadd.f32 %v226_v10, %v222_v12 }
  0x8f   : > { %234 = vst [vmem:[%s535_s6] sm:$0xff] %v230_v13 }
  0x91   : > { %v182_v14 = vpop.permute.xlu1 %181  ;;  %v178_v15 = vpop.permute.xlu0 %177 }
  0x92   : > { %v215_v17 = vsel %vm211_vm0, %v170_v2, %v182_v14  ;;  %v213_v24 = vsel %vm211_vm0, %v168_v3, %v178_v15 }
  0x93   : > { %v218_v30 = vsel %vm216_vm1, %v213_v24, %v190_v5 }
  0x99   : > { %v194_v18 = vpop.permute.xlu1 %193  ;;  %v192_v19 = vpop.permute.xlu0 %191 }
  0x9a   : > { %v220_v21 = vsel %vm216_vm1, %v215_v17, %v194_v18  ;;  %v219_v28 = vsel %vm216_vm1, %v214_v25, %v192_v19 }
  0x9b   : > { %v225_v22 = vsel %vm221_vm2, %v220_v21, %v206_v16 }
  0x9c   : > { %v233_v23 = vadd.f32 %v229_v20, %v225_v22 }
  0x9e   : > { %237 = vst [vmem:[%s535_s6 + $0x18] sm:$0xff] %v233_v23 }
  0xa1   : > { %v204_v29 = vpop.permute.xlu1 %203  ;;  %v202_v31 = vpop.permute.xlu0 %201 }
  0xa2   : > { %v224_v32 = vsel %vm221_vm2, %v219_v28, %v204_v29  ;;  %v223_v33 = vsel %vm221_vm2, %v218_v30, %v202_v31 }
  0xa3   : > { %v232_v34 = vadd.f32 %v228_v26, %v224_v32  ;;  %v231_v35 = vadd.f32 %v227_v27, %v223_v33 }
  0xa5   : > { %236 = vst [vmem:[%s535_s6 + $0x10] sm:$0xff] %v232_v34 }
  0xa6   : > { %235 = vst [vmem:[%s535_s6 + $0x8] sm:$0xff] %v231_v35 }
  0xa7   : > { %414 = shalt.err (!%p411_p3)
}
  0xa8   : > { %s454_s29 = smov 128   ;;  %s455_s30 = smov 8  }
  0xa9   : > { %343 = dma.vmem_to_hbm [thread:$0]  (%p509_p5), %s252_s17, 512, %s254_s21, %s239_s13, %s454_s29, %s454_s29, %s455_s30  }
  0xaa PF: > { %p349_p4 = scmp.ge.s32.totalorder %s449_s12, 2  ;;  %s268_s3 = sand.u32 1, %s437_s9  }
  0xab   : > { %s269_s4 = scalar_lea.sflag [#allocation3], %s268_s3 }
  0xac   : > { %p346_p7 = pnand %p349_p4, %p513_p6 }
  0xae   : > { %p347_p8 = pneg %p346_p7 }
  0xb0   : > { %432 = dma.done.wait (%p347_p8), %s269_s4, 512  }
  0xb1   : > { %434 = vsyncadd (%p347_p8), %s269_s4, 4294966784  ;;  %p12_p9 = scmp.ge.s32.totalorder %s496_s15, 4   ;;  %s592_s9 = smov %s441_s10 }
  0xb2   : > { %s593_s10 = smov %s445_s11  ;;  %s594_s11 = smov %s507_s18 }
  0xb3   : > { %s595_s12 = smov %s496_s15  ;;  %14 = sbr.rel (!%p12_p9) target bundleno = 3 (0x3), region = 66 }
  0xb8   :  { %275 = vsyncpa [#allocation3], 1 }
  0xb9   :  { %277 = vsyncpa [#allocation3 + $0x1], 1 }

</bundles_post_ra>
